<compile_context>
chip_gen: v6e
topology: v6e:2x2x1
jax: 0.10.0
libtpu: 0.0.40
codegen_flags: <defaults>
</compile_context>

<pallas_src>
import functools
import math

import numpy as np
import jax
import jax.numpy as jnp
from jax.experimental import pallas as pl
from jax.experimental.pallas import tpu as pltpu


# ---------------------------------------------------------------------------
# (m, n) schedule and radial-polynomial coefficients (mirror the torch code)
# ---------------------------------------------------------------------------
def _mn_schedule(number_invariants, skip_zero_order=True):
    rank = 1 if skip_zero_order else 0
    angle = 0
    sched = []
    while len(sched) != number_invariants:
        sched.append((angle, rank))
        if angle < rank:
            angle += 1
        else:
            angle = 0
            rank += 1
    return sched


def _radial_poly_coeffs(m, n, num_powers):
    """Dense coefficients c_p of R(r) = sum_p c_p * r**p (powers n-2k are ints)."""
    coefs = np.zeros((num_powers,), np.float64)
    a = (n + m) // 2
    b = (n - m) // 2
    for k in range(0, b + 1):
        f = ((-1.0) ** k) * math.factorial(n - k) / (
            math.factorial(k) * math.factorial(a - k) * math.factorial(b - k))
        coefs[n - 2 * k] += f
    return coefs.astype(np.float32)


def _round_up(x, m):
    return (x + m - 1) // m * m


def _pick_row_tile(nc, hw, itemsize):
    """Rows (of N*C) processed per grid step.

    Per-step VMEM working set ~= 2 * TR * HW * itemsize (double-buffered input)
    + ~7 * TR * HW * 4 (f32 temporaries: xn, xx, yy, r, radial, prod, ...).
    Budgeted conservatively so it also fits v5e's 16 MiB default scoped VMEM;
    v6e (128 MiB) and v7x (64 MiB) have headroom to raise this (and
    vmem_limit_bytes) for very large H*W.  When the row axis is tiled, TR is a
    multiple of 128 so the (1, TR) output block stays lane-dense and the
    (TR, HW) input block satisfies the (8, 128) rule.
    """
    budget = 10 * 1024 * 1024
    per_row = hw * (2 * itemsize + 7 * 4)
    cap = max(8, budget // max(per_row, 1))
    nc8 = _round_up(nc, 8)
    if nc8 <= min(cap, 256):
        return nc8                      # single row tile: every block == full array
    return int(max(128, min(256, (cap // 128) * 128)))


# ---------------------------------------------------------------------------
# Kernel: fused variance-norm + center-of-mass + Zernike-filtered pooling
# ---------------------------------------------------------------------------
def _zernike_rows_kernel(x_ref, tab_ref, grid_ref, o_ref, *,
                         n_powers, hw, eps, mask_thresh, variance_norm):
    f32 = jnp.float32
    x = x_ref[...].astype(f32)                     # (TR, HW)  f32 accumulation
    tab = tab_ref[...].astype(f32)                 # (TR, n_powers + 1)
    xg = grid_ref[0:1, :]                          # (1, HW) coordinate along H
    yg = grid_ref[1:2, :]                          # (1, HW) coordinate along W
    tr = x.shape[0]

    # --- variance normalization over the flattened spatial axis -----------
    if variance_norm:
        mean = jnp.sum(x, axis=-1, keepdims=True) * (1.0 / hw)
        d = x - mean
        var = jnp.sum(d * d, axis=-1, keepdims=True) * (1.0 / (hw - 1))  # unbiased
        xn = x * (1.0 / jnp.maximum(var, eps))
    else:
        xn = x

    # --- center of mass ----------------------------------------------------
    m00 = jnp.sum(xn, axis=-1, keepdims=True)
    inv_m00 = 1.0 / jnp.maximum(m00, eps)
    tx = jnp.sum(xn * xg, axis=-1, keepdims=True) * inv_m00     # (TR, 1)
    ty = jnp.sum(xn * yg, axis=-1, keepdims=True) * inv_m00

    # --- Zernike filter -----------------------------------------------------
    xx = xg - tx                                    # (TR, HW)
    yy = yg - ty
    r2 = xx * xx + yy * yy
    r = jnp.sqrt(r2)

    # radial polynomial via Horner on dense per-row coefficients
    radial = tab[:, n_powers - 1:n_powers]          # (TR, 1)
    for p in range(n_powers - 2, -1, -1):
        radial = radial * r + tab[:, p:p + 1]       # broadcasts to (TR, HW)

    mask = (r2 <= mask_thresh).astype(f32)

    # m == 0 : sum(Re(Z) * x) ;  m > 0 : sum(|Z * x|) == sum(|radial * x| * mask)
    prod = radial * xn
    flag = tab[:, n_powers:n_powers + 1]            # 1.0 where m == 0 else 0.0
    val = (flag * prod + (1.0 - flag) * jnp.abs(prod)) * mask
    res = jnp.sum(val, axis=-1, keepdims=True)      # (TR, 1)

    # --- lane-dense emit: place per-row scalars along lanes -----------------
    # (pure VPU + sublane reduce; avoids relying on sublane<->lane reshape)
    row_ids = jax.lax.broadcasted_iota(jnp.int32, (tr, tr), 0)
    lane_ids = jax.lax.broadcasted_iota(jnp.int32, (tr, tr), 1)
    scatter = jnp.where(row_ids == lane_ids, res, 0.0)           # (TR, TR)
    o_ref[...] = jnp.sum(scatter, axis=0, keepdims=True).astype(o_ref.dtype)


# ---------------------------------------------------------------------------
# Wrapper
# ---------------------------------------------------------------------------
def parallel_zernike_pooling(x, *, variance_norm=True, skip_zero_order=True,
                             filters_pad=0.1, circle_mask_pad=0.05, eps=1e-5):
    """ParallelZernikePooling.forward: x (N, C, S, S) -> (N, C) invariants."""
    N, C, H, W = x.shape
    if H != W:
        raise ValueError("ZernikePooling requires H == W == input_size")
    S = H
    HW = S * S
    NC = N * C

    sched = _mn_schedule(C, skip_zero_order)
    max_rank = max(n for _, n in sched)
    P = max_rank + 1                                 # radial powers 0 .. max_rank

    # per-channel dense coefficients + (m == 0) flag, tiled per row (row = n*C + c)
    chan_tab = np.zeros((C, P + 1), np.float32)
    for c, (m, n) in enumerate(sched):
        chan_tab[c, :P] = _radial_poly_coeffs(m, n, P)
        chan_tab[c, P] = 1.0 if m == 0 else 0.0
    row_tab = np.tile(chan_tab, (N, 1))

    # flattened coordinate grids (x varies along H, y varies along W), as in torch
    coords = np.linspace(-1.0 - filters_pad, 1.0 + filters_pad, S).astype(np.float32)
    grids = np.stack([np.repeat(coords, S), np.tile(coords, S)], axis=0)  # (2, HW)

    TR = _pick_row_tile(NC, HW, x.dtype.itemsize)
    NC_pad = _round_up(NC, TR)
    n_tiles = NC_pad // TR

    x2d = x.reshape(NC, HW)
    if NC_pad != NC:
        x2d = jnp.pad(x2d, ((0, NC_pad - NC), (0, 0)))
        row_tab = np.pad(row_tab, ((0, NC_pad - NC), (0, 0)))

    kernel = functools.partial(
        _zernike_rows_kernel,
        n_powers=P, hw=HW, eps=float(eps),
        mask_thresh=float(1.0 - filters_pad - circle_mask_pad),
        variance_norm=variance_norm)

    out = pl.pallas_call(
        kernel,
        out_shape=jax.ShapeDtypeStruct((1, NC_pad), jnp.float32),
        grid=(n_tiles,),
        in_specs=[
            pl.BlockSpec((TR, HW), lambda r: (r, 0)),        # x rows (streamed)
            pl.BlockSpec((TR, P + 1), lambda r: (r, 0)),     # per-row coeff table
            pl.BlockSpec((2, HW), lambda r: (0, 0)),         # coordinate grids
        ],
        out_specs=pl.BlockSpec((1, TR), lambda r: (0, r)),   # lane-dense row results
        compiler_params=pltpu.CompilerParams(
            dimension_semantics=("parallel",)),
        cost_estimate=pl.CostEstimate(
            flops=NC * HW * (6 * P + 30),
            transcendentals=2 * NC * HW,
            bytes_accessed=NC * HW * x.dtype.itemsize
            + NC_pad * (P + 1) * 4 + 2 * HW * 4 + NC_pad * 4),
    )(x2d, jnp.asarray(row_tab), jnp.asarray(grids))

    return out[0, :NC].reshape(N, C).astype(x.dtype)


# ---------------------------------------------------------------------------
# Pure-JAX reference (mirrors the PyTorch forward; verification only)
# ---------------------------------------------------------------------------
def parallel_zernike_pooling_reference(x, *, variance_norm=True, skip_zero_order=True,
                                       filters_pad=0.1, circle_mask_pad=0.05, eps=1e-5):
    N, C, H, W = x.shape
    S = H
    if variance_norm:
        var = jnp.var(x, axis=(2, 3), keepdims=True, ddof=1)
        xn = x / jnp.maximum(var, eps)
    else:
        xn = x
    coords = jnp.asarray(
        np.linspace(-1.0 - filters_pad, 1.0 + filters_pad, S).astype(np.float32))
    XX = jnp.broadcast_to(coords[:, None], (S, S))   # varies along H
    YY = jnp.broadcast_to(coords[None, :], (S, S))   # varies along W
    thresh = 1.0 - filters_pad - circle_mask_pad
    outs = []
    for c, (m, n) in enumerate(_mn_schedule(C, skip_zero_order)):
        xc = xn[:, c:c + 1]                                             # (N,1,S,S)
        m00 = jnp.sum(xc, axis=(2, 3), keepdims=True)
        tx = jnp.sum(xc * XX, axis=(2, 3), keepdims=True) / jnp.maximum(m00, eps)
        ty = jnp.sum(xc * YY, axis=(2, 3), keepdims=True) / jnp.maximum(m00, eps)
        xx = XX - tx
        yy = YY - ty
        r = jnp.sqrt(xx ** 2 + yy ** 2)
        ks = np.arange(0, (n - m) // 2 + 1)
        a, b = (n + m) // 2, (n - m) // 2
        factor = np.array(
            [((-1.0) ** k) * math.factorial(n - k)
             / (math.factorial(k) * math.factorial(a - k) * math.factorial(b - k))
             for k in ks], np.float32)
        expo = np.array([n - 2 * k for k in ks], np.float32)
        radial = jnp.sum(factor * jnp.power(r[..., None], expo), axis=-1)
        mask = (xx ** 2 + yy ** 2 <= thresh).astype(x.dtype)
        if m == 0:
            val = radial * mask * xc
        else:
            theta = jnp.arctan2(yy, xx)
            zr = radial * jnp.sin(m * theta) * mask
            zi = radial * jnp.cos(m * theta) * mask
            val = jnp.sqrt((zr * xc) ** 2 + (zi * xc) ** 2)
        outs.append(jnp.sum(val, axis=(2, 3)))                           # (N, 1)
    return jnp.concatenate(outs, axis=1).astype(x.dtype)


if __name__ == "__main__":
    key = jax.random.PRNGKey(0)
    N, C, S = 2, 4, 16   # batch=2, number_invariants=4 (== channels), input_size=16
    # Non-negative inputs (like typical feature maps) keep the center-of-mass
    # denominator well away from the eps clamp, so the check is well-conditioned.
    x = jax.random.uniform(key, (N, C, S, S), dtype=jnp.float32)

    out = parallel_zernike_pooling(x)
    out = jax.block_until_ready(out)

    ref = parallel_zernike_pooling_reference(x)
    assert out.shape == (N, C), out.shape
    assert bool(jnp.allclose(out, ref, rtol=1e-3, atol=1e-2)), (
        "mismatch vs reference:\n%s\n%s" % (np.asarray(out), np.asarray(ref)))

    print("KERNEL_OK")
</pallas_src>

<mosaic_0001>
module attributes {stable_mosaic.version = 11 : i64} {
  func.func @_zernike_rows_kernel(%arg0: i32, %arg1: memref<8x256xf32, #tpu.memory_space<vmem>>, %arg2: memref<8x4xf32, #tpu.memory_space<vmem>>, %arg3: memref<2x256xf32, #tpu.memory_space<vmem>>, %arg4: memref<1x8xf32, #tpu.memory_space<vmem>>) attributes {dimension_semantics = [#tpu.dimension_semantics<parallel>], iteration_bounds = array<i64: 1>, scalar_prefetch = 0 : i64, scratch_operands = 0 : i64, tpu.core_type = #tpu.core_type<tc>, window_params = [{transform_indices = @transform_0, window_bounds = array<i64: 8, 256>}, {transform_indices = @transform_1, window_bounds = array<i64: 8, 4>}, {pipeline_mode = #tpu.pipeline_mode<synchronous>, transform_indices = @transform_2, window_bounds = array<i64: 2, 256>}, {transform_indices = @transform_3, window_bounds = array<i64: 1, 8>}]} {
    %c0 = arith.constant 0 : index
    %c0_0 = arith.constant 0 : index
    %0 = vector.load %arg1[%c0, %c0_0] : memref<8x256xf32, #tpu.memory_space<vmem>>, vector<8x256xf32>
    %c0_1 = arith.constant 0 : index
    %c0_2 = arith.constant 0 : index
    %1 = vector.load %arg2[%c0_1, %c0_2] : memref<8x4xf32, #tpu.memory_space<vmem>>, vector<8x4xf32>
    %c0_3 = arith.constant 0 : index
    %c0_4 = arith.constant 0 : index
    %2 = vector.load %arg3[%c0_3, %c0_4] : memref<2x256xf32, #tpu.memory_space<vmem>>, vector<1x256xf32>
    %c1 = arith.constant 1 : index
    %c0_5 = arith.constant 0 : index
    %3 = vector.load %arg3[%c1, %c0_5] : memref<2x256xf32, #tpu.memory_space<vmem>>, vector<1x256xf32>
    %cst = arith.constant dense<0.000000e+00> : vector<8xf32>
    %4 = vector.multi_reduction <add>, %0, %cst [1] : vector<8x256xf32> to vector<8xf32>
    %5 = vector.shape_cast %4 : vector<8xf32> to vector<8x1xf32>
    %cst_6 = arith.constant 3.906250e-03 : f32
    %6 = vector.broadcast %cst_6 : f32 to vector<8x1xf32>
    %7 = arith.mulf %5, %6 : vector<8x1xf32>
    %8 = vector.broadcast %7 : vector<8x1xf32> to vector<8x256xf32>
    %9 = arith.subf %0, %8 : vector<8x256xf32>
    %10 = arith.mulf %9, %9 : vector<8x256xf32>
    %cst_7 = arith.constant dense<0.000000e+00> : vector<8xf32>
    %11 = vector.multi_reduction <add>, %10, %cst_7 [1] : vector<8x256xf32> to vector<8xf32>
    %12 = vector.shape_cast %11 : vector<8xf32> to vector<8x1xf32>
    %cst_8 = arith.constant 0.00392156886 : f32
    %13 = vector.broadcast %cst_8 : f32 to vector<8x1xf32>
    %14 = arith.mulf %12, %13 : vector<8x1xf32>
    %cst_9 = arith.constant 9.99999974E-6 : f32
    %15 = vector.broadcast %cst_9 : f32 to vector<8x1xf32>
    %16 = arith.maximumf %14, %15 : vector<8x1xf32>
    %cst_10 = arith.constant 1.000000e+00 : f32
    %17 = vector.broadcast %cst_10 : f32 to vector<8x1xf32>
    %18 = arith.divf %17, %16 : vector<8x1xf32>
    %19 = vector.broadcast %18 : vector<8x1xf32> to vector<8x256xf32>
    %20 = arith.mulf %0, %19 : vector<8x256xf32>
    %cst_11 = arith.constant dense<0.000000e+00> : vector<8xf32>
    %21 = vector.multi_reduction <add>, %20, %cst_11 [1] : vector<8x256xf32> to vector<8xf32>
    %22 = vector.shape_cast %21 : vector<8xf32> to vector<8x1xf32>
    %cst_12 = arith.constant 9.99999974E-6 : f32
    %23 = vector.broadcast %cst_12 : f32 to vector<8x1xf32>
    %24 = arith.maximumf %22, %23 : vector<8x1xf32>
    %cst_13 = arith.constant 1.000000e+00 : f32
    %25 = vector.broadcast %cst_13 : f32 to vector<8x1xf32>
    %26 = arith.divf %25, %24 : vector<8x1xf32>
    %27 = vector.broadcast %2 : vector<1x256xf32> to vector<8x256xf32>
    %28 = arith.mulf %20, %27 : vector<8x256xf32>
    %cst_14 = arith.constant dense<0.000000e+00> : vector<8xf32>
    %29 = vector.multi_reduction <add>, %28, %cst_14 [1] : vector<8x256xf32> to vector<8xf32>
    %30 = vector.shape_cast %29 : vector<8xf32> to vector<8x1xf32>
    %31 = arith.mulf %30, %26 : vector<8x1xf32>
    %32 = vector.broadcast %3 : vector<1x256xf32> to vector<8x256xf32>
    %33 = arith.mulf %20, %32 : vector<8x256xf32>
    %cst_15 = arith.constant dense<0.000000e+00> : vector<8xf32>
    %34 = vector.multi_reduction <add>, %33, %cst_15 [1] : vector<8x256xf32> to vector<8xf32>
    %35 = vector.shape_cast %34 : vector<8xf32> to vector<8x1xf32>
    %36 = arith.mulf %35, %26 : vector<8x1xf32>
    %37 = vector.broadcast %2 : vector<1x256xf32> to vector<8x256xf32>
    %38 = vector.broadcast %31 : vector<8x1xf32> to vector<8x256xf32>
    %39 = arith.subf %37, %38 : vector<8x256xf32>
    %40 = vector.broadcast %3 : vector<1x256xf32> to vector<8x256xf32>
    %41 = vector.broadcast %36 : vector<8x1xf32> to vector<8x256xf32>
    %42 = arith.subf %40, %41 : vector<8x256xf32>
    %43 = arith.mulf %39, %39 : vector<8x256xf32>
    %44 = arith.mulf %42, %42 : vector<8x256xf32>
    %45 = arith.addf %43, %44 : vector<8x256xf32>
    %46 = math.sqrt %45 : vector<8x256xf32>
    %47 = vector.extract_strided_slice %1 {offsets = [0, 2], sizes = [8, 1], strides = [1, 1]} : vector<8x4xf32> to vector<8x1xf32>
    %48 = vector.broadcast %47 : vector<8x1xf32> to vector<8x256xf32>
    %49 = arith.mulf %48, %46 : vector<8x256xf32>
    %50 = vector.extract_strided_slice %1 {offsets = [0, 1], sizes = [8, 1], strides = [1, 1]} : vector<8x4xf32> to vector<8x1xf32>
    %51 = vector.broadcast %50 : vector<8x1xf32> to vector<8x256xf32>
    %52 = arith.addf %49, %51 : vector<8x256xf32>
    %53 = arith.mulf %52, %46 : vector<8x256xf32>
    %54 = vector.extract_strided_slice %1 {offsets = [0, 0], sizes = [8, 1], strides = [1, 1]} : vector<8x4xf32> to vector<8x1xf32>
    %55 = vector.broadcast %54 : vector<8x1xf32> to vector<8x256xf32>
    %56 = arith.addf %53, %55 : vector<8x256xf32>
    %cst_16 = arith.constant 8.500000e-01 : f32
    %57 = vector.broadcast %cst_16 : f32 to vector<8x256xf32>
    %58 = arith.cmpf ole, %45, %57 : vector<8x256xf32>
    %59 = arith.extui %58 : vector<8x256xi1> to vector<8x256xi32>
    %60 = arith.sitofp %59 : vector<8x256xi32> to vector<8x256xf32>
    %61 = arith.mulf %56, %20 : vector<8x256xf32>
    %62 = vector.extract_strided_slice %1 {offsets = [0, 3], sizes = [8, 1], strides = [1, 1]} : vector<8x4xf32> to vector<8x1xf32>
    %63 = vector.broadcast %62 : vector<8x1xf32> to vector<8x256xf32>
    %64 = arith.mulf %63, %61 : vector<8x256xf32>
    %cst_17 = arith.constant 1.000000e+00 : f32
    %65 = vector.broadcast %cst_17 : f32 to vector<8x1xf32>
    %66 = arith.subf %65, %62 : vector<8x1xf32>
    %67 = math.absf %61 : vector<8x256xf32>
    %68 = vector.broadcast %66 : vector<8x1xf32> to vector<8x256xf32>
    %69 = arith.mulf %68, %67 : vector<8x256xf32>
    %70 = arith.addf %64, %69 : vector<8x256xf32>
    %71 = arith.mulf %70, %60 : vector<8x256xf32>
    %cst_18 = arith.constant dense<0.000000e+00> : vector<8xf32>
    %72 = vector.multi_reduction <add>, %71, %cst_18 [1] : vector<8x256xf32> to vector<8xf32>
    %73 = vector.shape_cast %72 : vector<8xf32> to vector<8x1xf32>
    %74 = tpu.iota {dimensions = array<i32: 0>} : vector<8x8xi32>
    %75 = tpu.iota {dimensions = array<i32: 1>} : vector<8x8xi32>
    %76 = arith.cmpi eq, %74, %75 : vector<8x8xi32>
    %cst_19 = arith.constant 0.000000e+00 : f32
    %77 = vector.shape_cast %73 : vector<8x1xf32> to vector<8x1xf32>
    %78 = vector.broadcast %77 : vector<8x1xf32> to vector<8x8xf32>
    %79 = vector.broadcast %cst_19 : f32 to vector<8x8xf32>
    %80 = arith.select %76, %78, %79 : vector<8x8xi1>, vector<8x8xf32>
    %cst_20 = arith.constant dense<0.000000e+00> : vector<8xf32>
    %81 = vector.multi_reduction <add>, %80, %cst_20 [0] : vector<8x8xf32> to vector<8xf32>
    %82 = vector.shape_cast %81 : vector<8xf32> to vector<1x8xf32>
    %c0_21 = arith.constant 0 : index
    %c0_22 = arith.constant 0 : index
    %83 = vector.load %arg4[%c0_21, %c0_22] : memref<1x8xf32, #tpu.memory_space<vmem>>, vector<1x8xf32>
    tpu.vector_store %arg4[%c0_21, %c0_22], %82 {strides = array<i32>} : memref<1x8xf32, #tpu.memory_space<vmem>>, vector<1x8xf32>,
    return
  }
  func.func @transform_0(%arg0: i32) -> (i32, i32) {
    %c0_i32 = arith.constant 0 : i32
    %c0_i32_0 = arith.constant 0 : i32
    return %arg0, %c0_i32 : i32, i32
  }
  func.func @transform_1(%arg0: i32) -> (i32, i32) {
    %c0_i32 = arith.constant 0 : i32
    %c0_i32_0 = arith.constant 0 : i32
    return %arg0, %c0_i32 : i32, i32
  }
  func.func @transform_2(%arg0: i32) -> (i32, i32) {
    %c0_i32 = arith.constant 0 : i32
    %c0_i32_0 = arith.constant 0 : i32
    %c0_i32_1 = arith.constant 0 : i32
    return %c0_i32, %c0_i32_0 : i32, i32
  }
  func.func @transform_3(%arg0: i32) -> (i32, i32) {
    %c0_i32 = arith.constant 0 : i32
    %c0_i32_0 = arith.constant 0 : i32
    return %c0_i32, %arg0 : i32, i32
  }
}

</mosaic_0001>

<bundles_post_ra>
// kernel: tpu_custom_call.1
= control target key start
LH: loop header
LB: loop body
LE: loop exit
PB: predicated region body
PF: predicated region fallthrough
CT: control target
= control target key end

     0   :  { %8 = vsyncpa [#allocation3], 0  ;;  %s325_s0 = inlined_call_operand.hbm [shape: f32[8,256], index: 0, kind: input, shape index: {}]   ;;  %s326_s1 = inlined_call_operand.vmem [shape: f32[8,4], index: 1, kind: input, shape index: {}]   ;;  %s327_s2 = inlined_call_operand.vmem [shape: f32[2,256], index: 2, kind: input, shape index: {}]   ;;  %s328_s3 = inlined_call_operand.hbm [shape: f32[1,8], index: 3, kind: output, shape index: {}]  }
   0x1   :  { %9 = vsyncpa [#allocation4], 0  ;;  %s264_s12 = smov [#allocation2]  }
   0x2   :  { %s16_s13 = sshll.u32 %s264_s12, 4  ;;  %s17_s13 = int_to_ptr.vmem [resolvable:$true] %s16_s13 }
   0x3   :  { %s228_s14 = scalar_lea.vmem %s17_s13, 256  ;;  %p233_p1 = scmp.lt.s32.totalorder %s17_s13, %s17_s13 }
   0x4   :  { %p229_p0 = scmp.ne.s32.totalorder %s17_s13, %s228_s14  ;;  %p234_p2 = scmp.lt.s32.totalorder %s228_s14, %s228_s14 }
   0x6   :  { %p235_p3 = por %p234_p2, %p233_p1 }
   0x8   :  { %p236_p4 = pnand %p235_p3, %p229_p0 }
   0xa   :  { %239 = shalt.err (!%p236_p4)
}
   0xb   :  { %19 = dma.hbm_to_vmem [thread:$0]  %s325_s0, 256, %s17_s13, [#allocation3]  }
   0xc   :  { %260 = dma.done.wait [#allocation3], 256  }
   0xd   :  { %261 = vsyncadd [#allocation3], 4294967040  ;;  %v27_v0 = vld [vmem:[#allocation2] sm:$0xff]  ;;  %v28_v1 = vld [vmem:[#allocation2 + $0x8] sm:$0xff]  ;;  %v265_v10 = vmov 2   ;;  %v266_v11 = vmov 1   ;;  %v57_v15 = vlaneseq }
   0xe   :  { %v33_v2 = vadd.f32 %v28_v1, %v27_v0  ;;  %207 = vset.pattern.permute.xlu1 %v265_v10  ;;  %208 = vset.pattern.permute.xlu0 %v266_v11  ;;  %v197_v19 = vld [vmem:[%s327_s2 + $0x1] ss:$2 sm:$0x3]  ;;  %v30_v20 = vld [vmem:[%s327_s2] ss:$2 sm:$0x3] }
   0xf   :  { %v295_v16 = vshrl.u32 %v57_v15, 7  ;;  %v29_v35 = vld [vmem:[%s326_s1] sm:$0xff]  ;;  %v267_v36 = vmov 0   ;;  %v268_v37 = vmov 3   ;;  %vm172_vm7 = vcmask 64512   ;;  %s270_s1 = smov [#allocation5]  }
  0x10   :  { %34 = vadd.xlane.f32.xlu0 %v33_v2  ;;  %v149_v38 = vsub.f32 1.0, %v29_v35  ;;  %s188_s21 = sshll.u32 %s270_s1, 4  ;;  %vm180_vm8 = vcmask 57344   ;;  %s189_s21 = int_to_ptr.vmem [resolvable:$true] %s188_s21 }
  0x11   :  { %v59_v17 = vsub.s32 0, %v295_v16  ;;  %v63_v18 = vsub.s32 1, %v295_v16  ;;  %s240_s22 = scalar_lea.vmem %s189_s21, 16  ;;  %s244_s23 = scalar_lea.vmem %s189_s21, 32 }
  0x12   :  { %p241_p5 = scmp.ne.s32.totalorder %s189_s21, %s240_s22  ;;  %p245_p6 = scmp.lt.s32.totalorder %s189_s21, %s189_s21 }
  0x13   :  { %v77_v21 = vrot.slane %v197_v19, %v59_v17  ;;  %v81_v22 = vrot.slane %v197_v19, %v63_v18  ;;  %v60_v23 = vrot.slane %v30_v20, %v59_v17  ;;  %v64_v25 = vrot.slane %v30_v20, %v63_v18  ;;  %p246_p7 = scmp.lt.s32.totalorder %s244_s23, %s240_s22 }
  0x15   :  { %p247_p8 = por %p246_p7, %p245_p6 }
  0x17   :  { %p248_p9 = pnand %p247_p8, %p241_p5 }
  0x99   :  { %v35_v3 = vpop.xlane.xlu0 %34 }
  0x9a   :  { %v36_v4 = vmul.f32 0.00390625, %v35_v3 }
  0x9c   :  { %v37_v5 = vsub.f32 %v27_v0, %v36_v4  ;;  %v38_v6 = vsub.f32 %v28_v1, %v36_v4 }
  0x9e   :  { %v39_v7 = vmul.f32 %v37_v5, %v37_v5  ;;  %v40_v8 = vmul.f32 %v38_v6, %v38_v6 }
  0xa0   :  { %v41_v9 = vadd.f32 %v40_v8, %v39_v7 }
  0xa2   :  { %42 = vadd.xlane.f32.xlu0 %v41_v9 }
 0x12b   :  { %v43_v12 = vpop.xlane.xlu0 %42 }
 0x12c   :  { %v44_v13 = vmul.f32 0.003921569, %v43_v12 }
 0x12e   :  { %v45_v14 = vmax.f32 %v44_v13, 1e-05 }
 0x130   :  { %212 = vrcp.f32 %v45_v14 }
 0x13d   :  { %v213_v24 = vpop.eup %212 }
 0x13e   :  { %v305_v26 = vmul.f32 %v213_v24, %v27_v0  ;;  %v307_v27 = vmul.f32 %v213_v24, %v28_v1 }
 0x140   :  { %v50_v28 = vadd.f32 %v307_v27, %v305_v26  ;;  %v84_v29 = vmul.f32 %v77_v21, %v305_v26  ;;  %v85_v30 = vmul.f32 %v81_v22, %v307_v27  ;;  %v67_v31 = vmul.f32 %v60_v23, %v305_v26 }
 0x141   :  { %v68_v32 = vmul.f32 %v64_v25, %v307_v27 }
 0x142   :  { %51 = vadd.xlane.f32.xlu1 %v50_v28  ;;  %v86_v33 = vadd.f32 %v85_v30, %v84_v29  ;;  %v269_v29 = vmov 0.0  }
 0x143   :  { %v69_v34 = vadd.f32 %v68_v32, %v67_v31 }
 0x144   :  { %87 = vadd.xlane.f32.xlu0 %v86_v33 }
 0x146   :  { %70 = vadd.xlane.f32.xlu1 %v69_v34 }
 0x157   :  { %116 = vperm.xlu1 %207, %v29_v35  }
 0x15a   :  { %122 = vperm.xlu0 %208, %v29_v35  }
 0x15b   :  { %209 = vset.pattern.permute.xlu1 %v267_v36 }
 0x15c   :  { %130 = vperm.xlu1 %209, %v29_v35  }
 0x15e   :  { %211 = vset.pattern.permute.xlu0 %v268_v37 }
 0x160   :  { %210 = vset.pattern.permute.xlu1 %v268_v37 }
 0x161   :  { %144 = vperm.xlu1 %210, %v29_v35  }
 0x165   :  { %154 = vperm.xlu1 %210, %v149_v38  }
 0x1cb   :  { %v52_v39 = vpop.xlane.xlu1 %51 }
 0x1cc   :  { %v53_v40 = vmax.f32 %v52_v39, 1e-05 }
 0x1cd   :  { %v88_v42 = vpop.xlane.xlu0 %87 }
 0x1ce   :  { %214 = vrcp.f32 %v53_v40 }
 0x1cf   :  { %v71_v43 = vpop.xlane.xlu1 %70 }
 0x1d3   :  { %v117_v56 = vpop.permute.xlu1 %116 }
 0x1d5   :  { %v123_v3 = vpop.permute.xlu0 %122 }
 0x1d7   :  { %v131_v2 = vpop.permute.xlu1 %130 }
 0x1db   :  { %v215_v41 = vpop.eup %214 }
 0x1dc   :  { %v89_v44 = vmul.f32 %v215_v41, %v88_v42  ;;  %v72_v45 = vmul.f32 %v215_v41, %v71_v43  ;;  %v145_v11 = vpop.permute.xlu1 %144 }
 0x1de   :  { %v92_v46 = vsub.f32 %v77_v21, %v89_v44  ;;  %v93_v47 = vsub.f32 %v81_v22, %v89_v44  ;;  %v90_v48 = vsub.f32 %v60_v23, %v72_v45  ;;  %v91_v49 = vsub.f32 %v64_v25, %v72_v45 }
 0x1e0   :  { %v96_v50 = vmul.f32 %v92_v46, %v92_v46  ;;  %v97_v51 = vmul.f32 %v93_v47, %v93_v47  ;;  %v94_v52 = vmul.f32 %v90_v48, %v90_v48  ;;  %v95_v53 = vmul.f32 %v91_v49, %v91_v49  ;;  %v155_v20 = vpop.permute.xlu1 %154 }
 0x1e2   :  { %v98_v54 = vadd.f32 %v96_v50, %v94_v52  ;;  %v99_v55 = vadd.f32 %v97_v51, %v95_v53 }
 0x1e4   :  { %216 = vrsqrt.f32 %v98_v54  ;;  %vm102_vm0 = vcmp.eq.f32.partialorder %v98_v54, inf  ;;  %v105_v60 = vand.u32 2147483648, %v98_v54  ;;  %vm104_vm1 = vcmp.eq.f32.partialorder %v98_v54, 0.0 }
 0x1e5   :  { %218 = vrsqrt.f32 %v99_v55  ;;  %vm109_vm2 = vcmp.eq.f32.partialorder %v99_v55, inf  ;;  %v112_v63 = vand.u32 2147483648, %v99_v55  ;;  %vm111_vm3 = vcmp.eq.f32.partialorder %v99_v55, 0.0 }
 0x1e6   :  { %vm135_vm4 = vcmp.le.f32.partialorder %v98_v54, 0.85  ;;  %vm136_vm5 = vcmp.le.f32.partialorder %v99_v55, 0.85 }
 0x1e7   :  { %v198_v30 = vsel %vm135_vm4, 1.0, %v269_v29  ;;  %v199_v31 = vsel %vm136_vm5, 1.0, %v269_v29 }
 0x1f1   :  { %v217_v57 = vpop.eup %216 }
 0x1f2   :  { %v219_v58 = vpop.eup %218  ;;  %v101_v59 = vmul.f32 %v217_v57, %v98_v54 }
 0x1f3   :  { %v108_v61 = vmul.f32 %v219_v58, %v99_v55 }
 0x1f4   :  { %v103_v62 = vsel %vm102_vm0, %v98_v54, %v101_v59 }
 0x1f5   :  { %v106_v0 = vsel %vm104_vm1, %v105_v60, %v103_v62  ;;  %v110_v1 = vsel %vm109_vm2, %v99_v55, %v108_v61 }
 0x1f6   :  { %v113_v4 = vsel %vm111_vm3, %v112_v63, %v110_v1  ;;  %v119_v5 = vmul.f32 %v117_v56, %v106_v0 }
 0x1f7   :  { %v120_v6 = vmul.f32 %v117_v56, %v113_v4 }
 0x1f8   :  { %v125_v7 = vadd.f32 %v123_v3, %v119_v5 }
 0x1f9   :  { %v126_v8 = vadd.f32 %v123_v3, %v120_v6 }
 0x1fa   :  { %v127_v9 = vmul.f32 %v125_v7, %v106_v0 }
 0x1fb   :  { %v128_v10 = vmul.f32 %v126_v8, %v113_v4 }
 0x1fc   :  { %v133_v12 = vadd.f32 %v131_v2, %v127_v9 }
 0x1fd   :  { %v134_v13 = vadd.f32 %v131_v2, %v128_v10 }
 0x1fe   :  { %v141_v14 = vmul.f32 %v133_v12, %v305_v26  ;;  %v169_v26 = vand.u32 127, %v57_v15 }
 0x1ff   :  { %v142_v17 = vmul.f32 %v134_v13, %v307_v27 }
 0x200   :  { %v150_v18 = vand.u32 2147483647, %v141_v14  ;;  %v147_v21 = vmul.f32 %v145_v11, %v141_v14  ;;  %vm170_vm6 = vcmp.eq.s32.totalorder %v295_v16, %v169_v26 }
 0x201   :  { %v151_v19 = vand.u32 2147483647, %v142_v17  ;;  %v148_v23 = vmul.f32 %v145_v11, %v142_v17 }
 0x202   :  { %v157_v22 = vmul.f32 %v155_v20, %v150_v18 }
 0x203   :  { %v158_v24 = vmul.f32 %v155_v20, %v151_v19 }
 0x204   :  { %v159_v25 = vadd.f32 %v157_v22, %v147_v21 }
 0x205   :  { %v160_v28 = vadd.f32 %v158_v24, %v148_v23 }
 0x206   :  { %v161_v32 = vmul.f32 %v198_v30, %v159_v25 }
 0x207   :  { %v162_v33 = vmul.f32 %v199_v31, %v160_v28 }
 0x209   :  { %v163_v34 = vadd.f32 %v162_v33, %v161_v32 }
 0x20b   :  { %164 = vadd.xlane.f32.xlu1 %v163_v34 }
 0x294   :  { %v165_v27 = vpop.xlane.xlu1 %164 }
 0x295   :  { %v171_v35 = vsel %vm170_vm6, %v165_v27, 0.0 }
 0x296   :  { %v173_v36 = vsel %vm172_vm7, %v171_v35, 0.0 }
 0x297   :  { %v174_v37 = vrot.slane %v173_v36, 4 }
 0x299   :  { %v175_v38 = vadd.f32 %v174_v37, %v173_v36 }
 0x29b   :  { %v176_v39 = vrot.slane %v175_v38, 2 }
 0x29d   :  { %v177_v40 = vadd.f32 %v176_v39, %v175_v38 }
 0x29f   :  { %v178_v41 = vrot.slane %v177_v40, 1 }
 0x2a1   :  { %v179_v42 = vadd.f32 %v178_v41, %v177_v40 }
 0x2a3   :  { %181 = vst.msk [vmem:[#allocation5] sm:$0x1] %vm180_vm8, %v179_v42 }
 0x2a4   :  { %251 = shalt.err (!%p248_p9)
}
 0x2a5   :  { %191 = dma.vmem_to_hbm [thread:$0]  %s189_s21, 16, %s328_s3, [#allocation4]  }
 0x2a6   :  { %262 = dma.done.wait [#allocation4], 16  }
 0x2a7   :  { %263 = vsyncadd [#allocation4], 4294967280 }
 0x2a8   :  { %195 = vsyncpa [#allocation3], 1 }
 0x2a9   :  { %196 = vsyncpa [#allocation4], 1 }

</bundles_post_ra>
